<compile_context>
chip_gen: v6e
topology: v6e:2x2x1
jax: 0.10.0
libtpu: 0.0.40
codegen_flags: <defaults>
</compile_context>

<pallas_src>
import jax
import jax.numpy as jnp
from jax.experimental import pallas as pl
from jax.experimental.pallas import tpu as pltpu

_LANES = 128


def _quant_rs_kernel(x_ref, o_ref):
    # Cast to f32 inside the kernel (free VPU work hidden under the HBM DMA).
    x = x_ref[...].astype(jnp.float32)
    x = jnp.clip(x, 0.0, 1.0)
    # jnp.round matches torch.round (round-half-to-even).  Keep the explicit
    # divide for bit-exactness with the reference; it is hidden under DMA.
    y = jnp.round(x * 255.0) / 255.0
    o_ref[...] = y.astype(o_ref.dtype)


def _pick_tile_rows(rows: int, dtype) -> int:
    """Pick a block row count: ~4 MiB blocks, sublane-aligned, >=2 grid steps."""
    itemsize = jnp.dtype(dtype).itemsize
    sub = 8 * max(1, 4 // itemsize)          # sublane packing: 8 f32 / 16 bf16 / 32 i8
    if rows <= sub:
        return rows                          # block equals full array extent
    target = (4 << 20) // (_LANES * itemsize)  # 8192 f32 / 16384 bf16 / 32768 i8
    tile = min(target, pl.cdiv(rows, sub) * sub)
    if tile >= rows:
        # Split into >=2 grid steps so both v7x TensorCores get work.
        tile = pl.cdiv(pl.cdiv(rows, 2), sub) * sub
    return max(sub, tile)


def quantization_rs(x: jax.Array, *, min_kernel_elems: int = 1 << 16) -> jax.Array:
    """Forward pass of Quantization_RS as a Pallas TPU kernel.

    Works for any float dtype/shape; math is done in float32 inside the kernel
    and stored back in the input dtype.
    """
    orig_shape = x.shape
    dtype = x.dtype
    n = x.size
    itemsize = jnp.dtype(dtype).itemsize

    # Small-input fast path: a fused XLA elementwise op beats kernel dispatch
    # plus reshape plumbing for tiny tensors.  Same math as the kernel.
    if n < min_kernel_elems:
        y = jnp.round(jnp.clip(x.astype(jnp.float32), 0.0, 1.0) * 255.0) / 255.0
        return y.astype(dtype)

    # Flatten to a lane-dense 2-D slab (rows, 128).  Pad ONLY when the element
    # count is not already a multiple of 128; ragged rows (not a multiple of 8)
    # are handled by Pallas masking the last grid block.
    rows = pl.cdiv(n, _LANES)
    total = rows * _LANES
    flat = x.reshape(-1)
    padded = total != n
    if padded:
        flat = jnp.pad(flat, (0, total - n))
    x2d = flat.reshape(rows, _LANES)

    tile_rows = _pick_tile_rows(rows, dtype)
    grid = (pl.cdiv(rows, tile_rows),)

    out2d = pl.pallas_call(
        _quant_rs_kernel,
        out_shape=jax.ShapeDtypeStruct((rows, _LANES), dtype),
        grid_spec=pltpu.PrefetchScalarGridSpec(
            num_scalar_prefetch=0,
            grid=grid,
            in_specs=[pl.BlockSpec((tile_rows, _LANES), lambda i: (i, 0))],
            out_specs=pl.BlockSpec((tile_rows, _LANES), lambda i: (i, 0)),
        ),
        compiler_params=pltpu.CompilerParams(
            dimension_semantics=("parallel",),
            vmem_limit_bytes=32 << 20,
        ),
        cost_estimate=pl.CostEstimate(
            flops=3 * n,
            transcendentals=0,
            bytes_accessed=2 * total * itemsize,
        ),
    )(x2d)

    if padded:
        return out2d.reshape(-1)[:n].reshape(orig_shape)
    return out2d.reshape(orig_shape)


def _ref(x):
    return jnp.round(jnp.clip(x, 0.0, 1.0) * 255.0) / 255.0


if __name__ == "__main__":
    key = jax.random.PRNGKey(0)
    # Module's forward is elementwise on an image-like tensor (NCHW).
    x = jax.random.uniform(key, (2, 4, 16, 16), dtype=jnp.float32,
                           minval=-0.25, maxval=1.25)

    # Force the Pallas kernel path even for this small demo tensor.
    y = quantization_rs(x, min_kernel_elems=0)
    jax.block_until_ready(y)
    assert y.shape == x.shape and y.dtype == x.dtype
    assert jnp.max(jnp.abs(y - _ref(x))) < 1e-6

    # Non-128-aligned element count: exercises the pad + ragged-last-block path.
    x2 = jax.random.uniform(jax.random.PRNGKey(1), (3, 3, 37, 41),
                            dtype=jnp.float32, minval=-0.5, maxval=1.5)
    y2 = quantization_rs(x2, min_kernel_elems=0)
    jax.block_until_ready(y2)
    assert y2.shape == x2.shape and y2.dtype == x2.dtype
    assert jnp.max(jnp.abs(y2 - _ref(x2))) < 1e-6

    # Default small-input fast path (plain XLA) gives identical results.
    y3 = quantization_rs(x)
    jax.block_until_ready(y3)
    assert jnp.max(jnp.abs(y3 - _ref(x))) < 1e-6

    print("KERNEL_OK")
</pallas_src>

<mosaic_0001>
module attributes {stable_mosaic.version = 11 : i64} {
  func.func @_quant_rs_kernel(%arg0: i32, %arg1: memref<8x128xf32, #tpu.memory_space<vmem>>, %arg2: memref<8x128xf32, #tpu.memory_space<vmem>>) attributes {dimension_semantics = [#tpu.dimension_semantics<parallel>], iteration_bounds = array<i64: 2>, scalar_prefetch = 0 : i64, scratch_operands = 0 : i64, tpu.core_type = #tpu.core_type<tc>, window_params = [{transform_indices = @transform_0, window_bounds = array<i64: 8, 128>}, {transform_indices = @transform_1, window_bounds = array<i64: 8, 128>}]} {
    %c0 = arith.constant 0 : index
    %c0_0 = arith.constant 0 : index
    %0 = vector.load %arg1[%c0, %c0_0] : memref<8x128xf32, #tpu.memory_space<vmem>>, vector<8x128xf32>
    %cst = arith.constant 0.000000e+00 : f32
    %cst_1 = arith.constant 1.000000e+00 : f32
    %1 = vector.broadcast %cst : f32 to vector<8x128xf32>
    %2 = arith.maximumf %1, %0 : vector<8x128xf32>
    %3 = vector.broadcast %cst_1 : f32 to vector<8x128xf32>
    %4 = arith.minimumf %3, %2 : vector<8x128xf32>
    %cst_2 = arith.constant 2.550000e+02 : f32
    %5 = vector.broadcast %cst_2 : f32 to vector<8x128xf32>
    %6 = arith.mulf %4, %5 : vector<8x128xf32>
    %7 = math.roundeven %6 : vector<8x128xf32>
    %cst_3 = arith.constant 2.550000e+02 : f32
    %8 = vector.broadcast %cst_3 : f32 to vector<8x128xf32>
    %9 = arith.divf %7, %8 : vector<8x128xf32>
    %c0_4 = arith.constant 0 : index
    %c0_5 = arith.constant 0 : index
    %10 = vector.load %arg2[%c0_4, %c0_5] : memref<8x128xf32, #tpu.memory_space<vmem>>, vector<8x128xf32>
    tpu.vector_store %arg2[%c0_4, %c0_5], %9 {strides = array<i32>} : memref<8x128xf32, #tpu.memory_space<vmem>>, vector<8x128xf32>,
    return
  }
  func.func @transform_0(%arg0: i32) -> (i32, i32) {
    %c0_i32 = arith.constant 0 : i32
    %c0_i32_0 = arith.constant 0 : i32
    return %arg0, %c0_i32 : i32, i32
  }
  func.func @transform_1(%arg0: i32) -> (i32, i32) {
    %c0_i32 = arith.constant 0 : i32
    %c0_i32_0 = arith.constant 0 : i32
    return %arg0, %c0_i32 : i32, i32
  }
}

</mosaic_0001>

<bundles_post_ra>
// kernel: tpu_custom_call.1
= control target key start
LH: loop header
LB: loop body
LE: loop exit
PB: predicated region body
PF: predicated region fallthrough
CT: control target
= control target key end

     0   :  { %6 = vsyncpa [#allocation3], 0  ;;  %s537_s0 = inlined_call_operand.hbm [shape: f32[16,128], index: 0, kind: input, shape index: {}]   ;;  %s538_s1 = inlined_call_operand.hbm [shape: f32[16,128], index: 1, kind: output, shape index: {}]  }
   0x1   :  { %8 = vsyncpa [#allocation3 + $0x1], 0 }
   0x2   :  { %9 = vsyncpa [#allocation4], 0 }
   0x3   :  { %11 = vsyncpa [#allocation4 + $0x1], 0  ;;  %s396_s6 = smov 0   ;;  %s398_s7 = smov 0  }
   0x4   :  { %s400_s8 = smov 0   ;;  %s402_s9 = smov 0  }
   0x5 LB: > { %s417_s10 = sadd.s32 4294967295, %s382_s9   ;;  %s224_s11 = sadd.s32 4294967294, %s382_s9   ;;  %s382_s9 = sphi %s402_s9, %s555_s9   ;;  %s378_s8 = sphi %s400_s8, %s554_s8   ;;  %s374_s7 = sphi %s398_s7, %s553_s7   ;;  %s370_s6 = sphi %s396_s6, %s552_s6  }
   0x6   : > { %s421_s12 = sadd.s32 1, %s382_s9   ;;  %s24_s13 = sadd.s32 1, %s378_s8 }
   0x7   : > { %s21_s14 = ssub.s32 %s382_s9, %s421_s12  ;;  %p31_p0 = scmp.ne.s32.totalorder %s378_s8, %s374_s7 }
   0x8   : > { %p22_p1 = scmp.eq.s32.totalorder %s21_s14, 0  ;;  %p32_p2 = scmp.eq.s32.totalorder %s382_s9, 0 }
   0x9   : > { %p37_p3 = scmp.ne.s32.totalorder %s374_s7, %s370_s6  ;;  %p38_p4 = scmp.eq.s32.totalorder %s417_s10, 0 }
   0xa   : > { %s433_s15 = scalar_select %p22_p1, %s378_s8, %s24_s13  }
   0xb   : > { %p435_p5 = por %p32_p2, %p31_p0  ;;  %p439_p6 = por %p38_p4, %p37_p3 }
   0xc   : > { %p61_p7 = scmp.eq.s32.totalorder %s417_s10, 1  ;;  %p67_p8 = scmp.eq.s32.totalorder %s224_s11, 1 }
   0xd   : > { %s542_s17 = scalar_select %p439_p6, 1, 0 }
   0xe   : > { %p256_p10 = scmp.lt.s32.totalorder %s382_s9, 2  ;;  %p446_p11 = por %p61_p7, %p31_p0 }
   0xf   : > { %p450_p12 = por %p67_p8, %p37_p3  ;;  %s87_s20 = sand.u32 1, %s378_s8  }
  0x10   : > { %s543_s18 = scalar_select %p446_p11, 1, 0 }
  0x11   : > { %s544_s19 = scalar_select %p450_p12, 1, 0 }
  0x12   : > { %s228_s21 = sshll.u32 %s382_s9, 7  ;;  %s227_s22 = sshll.u32 %s87_s20, 3 }
  0x13   : > { %s459_s25 = scalar_lea.hbm %s537_s0, %s228_s21  ;;  %s91_s26 = scalar_lea.vmem [#allocation2], %s227_s22 }
  0x14   : > { %s98_s27 = sshll.u32 %s91_s26, 4  ;;  %p463_p13 = pnand %p256_p10, %p435_p5  ;;  %s467_s27 = int_to_ptr.vmem [resolvable:$true] %s98_s27 }
  0x15   : > { %s88_s29 = scalar_lea.sflag [#allocation3], %s87_s20  ;;  %s290_s30 = scalar_lea.hbm %s459_s25, 128 }
  0x16   : > { %p291_p2 = scmp.ne.s32.totalorder %s459_s25, %s290_s30  ;;  %p292_p3 = pneg %p463_p13 }
  0x17   : > { %s295_s4 = scalar_lea.hbm %s537_s0, 256  ;;  %p296_p5 = scmp.lt.s32.totalorder %s459_s25, %s537_s0 }
  0x18   : > { %p293_p4 = pnand %p292_p3, %p291_p2  ;;  %p297_p8 = scmp.lt.s32.totalorder %s295_s4, %s290_s30 }
  0x1a   : > { %p294_p7 = pneg %p293_p4  ;;  %p298_p10 = por %p297_p8, %p296_p5 }
  0x1c   : > { %p299_p9 = pnand %p298_p10, %p294_p7 }
  0x1e   : > { %302 = shalt.err (!%p299_p9)
}
  0x1f   : > { %s303_s13 = scalar_lea.vmem %s467_s27, 128  ;;  %s384_s14 = smov [#allocation2]  }
  0x20   : > { %p304_p0 = scmp.ne.s32.totalorder %s467_s27, %s303_s13  ;;  %s308_s16 = sshll.u32 %s384_s14, 4  ;;  %s309_s16 = int_to_ptr.vmem [resolvable:$false] %s308_s16 }
  0x21   : > { %s310_s20 = scalar_lea.vmem %s309_s16, 256  ;;  %p311_p4 = scmp.lt.s32.totalorder %s467_s27, %s309_s16 }
  0x22   : > { %p306_p1 = pnand %p304_p0, %p292_p3  ;;  %p312_p12 = scmp.lt.s32.totalorder %s310_s20, %s303_s13 }
  0x24   : > { %p307_p2 = pneg %p306_p1  ;;  %p313_p11 = por %p312_p12, %p311_p4 }
  0x26   : > { %p314_p6 = pnand %p313_p11, %p307_p2 }
  0x28   : > { %317 = shalt.err (!%p314_p6)
}
  0x29   : > { %251 = dma.hbm_to_vmem [thread:$0]  (!%p463_p13), %s459_s25, 128, %s467_s27, %s88_s29  }
  0x2a   : > { %p546_p9 = scmp.lt.s32.totalorder %s382_s9, 3  ;;  %p547_p7 = scmp.ge.s32.totalorder %s382_s9, 1 }
  0x2c   : > { %p104_p0 = pnand %p547_p7, %p546_p9 }
  0x2d   : > { %s494_s21 = sand.u32 (!%p104_p0), 1, %s374_s7   ;;  %p548_p6 = scmp.ne.s32.totalorder (!%p104_p0), %s542_s17, 0 }
  0x2e   : > { %107 = sbr.rel (%p104_p0) target bundleno = 83 (0x53), region = 24  ;;  %s230_s22 = sshll.u32 (!%p104_p0), %s494_s21, 3 }
  0x2f   : > { %s110_s23 = scalar_lea.sflag (!%p104_p0), [#allocation3], %s494_s21  ;;  %s113_s24 = scalar_lea.vmem (!%p104_p0), [#allocation2], %s230_s22 }
  0x33   : > { %361 = dma.done.wait (%p548_p6), %s110_s23, 128  }
  0x34   : > { %363 = vsyncadd (%p548_p6), %s110_s23, 4294967168  ;;  %v132_v0 = vld [vmem:[%s113_s24] sm:$0xff]  ;;  %s131_s25 = scalar_lea.vmem [#allocation5], %s230_s22  ;;  %s233_s27 = sshll.u32 %s417_s10, 7 }
  0x35   : > { %v133_v1 = vmax.f32 %v132_v0, 0.0  ;;  %s154_s26 = sshll.u32 %s131_s25, 4  ;;  %s152_s29 = scalar_lea.hbm %s538_s1, %s233_s27  ;;  %s155_s26 = int_to_ptr.vmem [resolvable:$true] %s154_s26 }
  0x36   : > { %s141_s30 = scalar_lea.sflag [#allocation4], %s494_s21  ;;  %s318_s2 = scalar_lea.vmem %s155_s26, 128 }
  0x37   : > { %v134_v2 = vmin.f32 %v133_v1, 1.0  ;;  %p319_p11 = scmp.ne.s32.totalorder %s155_s26, %s318_s2  ;;  %p549_p12 = scmp.ne.s32.totalorder %s543_s18, 0 }
  0x38   : > { %s385_s3 = smov [#allocation5]  }
  0x39   : > { %v135_v3 = vmul.f32 255.0, %v134_v2  ;;  %p320_p13 = pnand %p319_p11, %p549_p12  ;;  %s322_s4 = sshll.u32 %s385_s3, 4  ;;  %s323_s4 = int_to_ptr.vmem [resolvable:$false] %s322_s4 }
  0x3a   : > { %s324_s5 = scalar_lea.vmem %s323_s4, 256  ;;  %p325_p3 = scmp.lt.s32.totalorder %s155_s26, %s323_s4 }
  0x3b   : > { %v238_v4 = vcvt.f32.s32 %v135_v3  ;;  %v236_v5 = vand.u32 2147483647, %v135_v3  ;;  %v241_v7 = vand.u32 2147483648, %v135_v3  ;;  %p321_p1 = pneg %p320_p13  ;;  %p326_p5 = scmp.lt.s32.totalorder %s324_s5, %s318_s2 }
  0x3d   : > { %v239_v6 = vcvt.s32.f32 %v238_v4  ;;  %vm237_vm0 = vcmp.lt.f32.partialorder %v236_v5, 8388608.0  ;;  %p327_p8 = por %p326_p5, %p325_p3 }
  0x3f   : > { %v240_v8 = vand.u32 2147483647, %v239_v6  ;;  %p328_p10 = pnand %p327_p8, %p321_p1 }
  0x41   : > { %v242_v9 = vor.u32 %v241_v7, %v240_v8 }
  0x43   : > { %v243_v10 = vsel %vm237_vm0, %v242_v9, %v135_v3 }
  0x44   : > { %v138_v11 = vmul.f32 0.003921569, %v243_v10 }
  0x46   : > { %139 = vst [vmem:[%s131_s25] sm:$0xff] %v138_v11 }
  0x47   : > { %331 = shalt.err (!%p328_p10)
}
  0x48   : > { %s332_s10 = scalar_lea.hbm %s152_s29, 128  ;;  %s336_s14 = scalar_lea.hbm %s538_s1, 256 }
  0x49   : > { %p333_p2 = scmp.ne.s32.totalorder %s152_s29, %s332_s10  ;;  %p337_p7 = scmp.lt.s32.totalorder %s152_s29, %s538_s1 }
  0x4a   : > { %p338_p0 = scmp.lt.s32.totalorder %s336_s14, %s332_s10 }
  0x4b   : > { %p334_p4 = pnand %p333_p2, %p549_p12 }
  0x4c   : > { %p339_p6 = por %p338_p0, %p337_p7 }
  0x4d   : > { %p335_p9 = pneg %p334_p4 }
  0x4f   : > { %p340_p11 = pnand %p339_p6, %p335_p9 }
  0x51   : > { %343 = shalt.err (!%p340_p11)
}
  0x52   : > { %246 = dma.vmem_to_hbm [thread:$0]  (%p549_p12), %s155_s26, 128, %s152_s29, %s141_s30  }
  0x53 PF: > { %s166_s21 = sand.u32 1, %s370_s6   ;;  %p550_p13 = scmp.ne.s32.totalorder %s544_s19, 0 }
  0x54   : > { %p551_p1 = scmp.ge.s32.totalorder %s382_s9, 2  ;;  %s167_s22 = scalar_lea.sflag [#allocation4], %s166_s21 }
  0x56   : > { %p253_p3 = pnand %p551_p1, %p550_p13 }
  0x58   : > { %p254_p5 = pneg %p253_p3 }
  0x5a   : > { %365 = dma.done.wait (%p254_p5), %s167_s22, 128  }
  0x5b   : > { %367 = vsyncadd (%p254_p5), %s167_s22, 4294967168  ;;  %p14_p8 = scmp.ge.s32.totalorder %s421_s12, 4   ;;  %s552_s6 = smov %s374_s7 }
  0x5c   : > { %s553_s7 = smov %s378_s8  ;;  %s554_s8 = smov %s433_s15 }
  0x5d   : > { %s555_s9 = smov %s421_s12  ;;  %16 = sbr.rel (!%p14_p8) target bundleno = 5 (0x5), region = 69 }
  0x62   :  { %172 = vsyncpa [#allocation3], 1 }
  0x63   :  { %174 = vsyncpa [#allocation3 + $0x1], 1 }
  0x64   :  { %175 = vsyncpa [#allocation4], 1 }
  0x65   :  { %177 = vsyncpa [#allocation4 + $0x1], 1 }

</bundles_post_ra>
